<compile_context>
chip_gen: v6e
topology: v6e:2x2x1
jax: 0.10.0
libtpu: 0.0.40
codegen_flags: <defaults>
</compile_context>

<pallas_src>
import math
import jax
import jax.numpy as jnp
from jax import lax
from jax.experimental import pallas as pl
from jax.experimental.pallas import tpu as pltpu


# ---------------------------------------------------------------------------
# Pass 1: tiny sequential tanh recurrence over the batch axis -> S (B, T)
#   h_b = tanh(c + h_{b-1} @ W_hh^T),  h_{-1} = 0,  S[b] = h_b
# ---------------------------------------------------------------------------
def _recurrence_kernel(c_ref, whht_ref, s_ref):
    c = c_ref[...]           # (1, T)  hoisted constant pre-activation
    whh_t = whht_ref[...]    # (T, T)  W_hh^T
    nb = s_ref.shape[0]      # number of batch rows (static)

    def body(i, h):
        h_new = jnp.tanh(c + jnp.dot(h, whh_t, preferred_element_type=jnp.float32))
        s_ref[pl.ds(i, 1), :] = h_new
        return h_new

    # Latency-bound chain (each step waits on the previous tanh): cap unroll.
    lax.fori_loop(0, nb, body, jnp.zeros_like(c), unroll=min(nb, 8))


# ---------------------------------------------------------------------------
# Pass 2: fully parallel gated Q projection on flattened rows
#   out[r, :] = s[r] * (x[r, :] @ Wq^T)
# ---------------------------------------------------------------------------
def _gated_q_kernel(x_ref, wqt_ref, s_ref, out_ref):
    x = x_ref[...].astype(jnp.bfloat16)                     # in-kernel cast
    q = jnp.dot(x, wqt_ref[...], preferred_element_type=jnp.float32)  # (TR, D)
    out_ref[...] = (q * s_ref[...]).astype(out_ref.dtype)   # (TR,1) lane splat


def _pick_row_block(n_rows, D):
    """Row-block size: multiple of 8 dividing n_rows, fits a conservative VMEM
    budget, keeps grid >= 2 (v7x megacore) and targets ~512 rows/block."""
    per_row = 2 * (4 * D) * 2 + 2 * 4      # x + out f32, double-buffered, + s
    budget = 40 << 20                      # headroom under v7x's 64 MiB / TC
    divisors = [d for d in range(8, n_rows + 1, 8) if n_rows % d == 0]
    if not divisors:
        return n_rows                      # full-extent block satisfies layout rule
    fitting = [d for d in divisors if d * per_row <= budget] or [divisors[0]]
    grid_ge2 = [d for d in fitting if n_rows // d >= 2]
    cands = grid_ge2 or fitting
    return min(cands, key=lambda d: abs(d - 512))


def recurrent_retention(x, wq, wk, wv, w_ih, w_hh, b_ih, b_hh, gamma=0.96875):
    B, T, D = x.shape
    f32 = jnp.float32
    del wk, wv  # dead in the forward: the bias_hh_l0 "injection" is a no-op.

    # ---- hoisted constants (identical for every batch step) ----------------
    gamma_row = jnp.full((T,), gamma, dtype=f32)
    c = (w_ih.astype(f32) @ gamma_row + b_ih.astype(f32)
         + b_hh.astype(f32)).reshape(1, T)                  # (1, T)
    whh_t = w_hh.astype(f32).T                              # (T, T)

    # ---- pass 1: sequential recurrence -> S (B, T) --------------------------
    # TODO(synk): for very large B this could become a plain lax.scan in the
    # wrapper (review); kept as one tiny single-launch Pallas pass here.
    s = pl.pallas_call(
        _recurrence_kernel,
        out_shape=jax.ShapeDtypeStruct((B, T), f32),
        grid_spec=pltpu.PrefetchScalarGridSpec(
            num_scalar_prefetch=0,
            grid=(1,),
            in_specs=[pl.BlockSpec((1, T), lambda i: (0, 0)),
                      pl.BlockSpec((T, T), lambda i: (0, 0))],
            out_specs=pl.BlockSpec((B, T), lambda i: (0, 0)),
        ),
        compiler_params=pltpu.CompilerParams(
            dimension_semantics=("arbitrary",)),
    )(c, whh_t)

    # ---- pass 2: parallel gated Q projection --------------------------------
    n_rows = B * T
    x2 = x.reshape(n_rows, D)            # free (contiguous view)
    s_col = s.reshape(n_rows, 1)         # tiny relayout; rows land on sublanes
    wq_t = wq.T.astype(jnp.bfloat16)     # (D, D); x cast to bf16 in-kernel

    TR = _pick_row_block(n_rows, D)

    # TODO(synk): on v7x with large D, mark the weight BlockSpec with
    # pipeline_mode=pl.Buffered(1) (constant index_map) to avoid a second
    # weight buffer; unnecessary at these shapes.
    # TODO(synk): emit bf16 output / pad D to a multiple of 128 if the consumer
    # tolerates it; kept f32 with native D for parity with the PyTorch module.
    out2 = pl.pallas_call(
        _gated_q_kernel,
        out_shape=jax.ShapeDtypeStruct((n_rows, D), f32),
        grid_spec=pltpu.PrefetchScalarGridSpec(
            num_scalar_prefetch=0,
            grid=(n_rows // TR,),
            in_specs=[
                pl.BlockSpec((TR, D), lambda i: (i, 0)),    # x rows (f32)
                pl.BlockSpec((D, D), lambda i: (0, 0)),     # Wq^T (bf16)
                pl.BlockSpec((TR, 1), lambda i: (i, 0)),    # gate column (f32)
            ],
            out_specs=pl.BlockSpec((TR, D), lambda i: (i, 0)),
        ),
        compiler_params=pltpu.CompilerParams(
            dimension_semantics=("parallel",),              # megacore-shardable
            vmem_limit_bytes=64 * 1024 * 1024),             # > 16/32 MiB defaults
    )(x2, wq_t, s_col)
    return out2.reshape(B, T, D)


def _reference(x, wq, w_ih, w_hh, b_ih, b_hh, gamma=0.96875):
    """Pure-JAX reference mirroring the PyTorch forward (bias no-op reproduced)."""
    B, T, D = x.shape
    q = jnp.einsum('btd,ed->bte', x, wq)
    gamma_row = jnp.full((T,), gamma, dtype=jnp.float32)
    c = w_ih @ gamma_row + b_ih + b_hh
    h = jnp.zeros((T,), jnp.float32)
    rows = []
    for _ in range(B):
        h = jnp.tanh(c + w_hh @ h)
        rows.append(h)
    s = jnp.stack(rows)                                     # (B, T)
    return s[:, :, None] * q


if __name__ == "__main__":
    B, T, D = 2, 16, 32          # batch, seq_len, dim (num_heads unused: gn not in forward)
    gamma = 0.96875

    key = jax.random.PRNGKey(0)
    kx, kq, kk, kv, kih, khh, kbi, kbh = jax.random.split(key, 8)

    x = jax.random.normal(kx, (B, T, D), dtype=jnp.float32)

    # Deterministic, PyTorch-style uniform init bounds.
    bl = 1.0 / math.sqrt(D)      # Linear(dim, dim)
    br = 1.0 / math.sqrt(T)      # RNN(hidden=seq_len)
    wq = jax.random.uniform(kq, (D, D), minval=-bl, maxval=bl, dtype=jnp.float32)
    wk = jax.random.uniform(kk, (D, D), minval=-bl, maxval=bl, dtype=jnp.float32)
    wv = jax.random.uniform(kv, (D, D), minval=-bl, maxval=bl, dtype=jnp.float32)
    w_ih = jax.random.uniform(kih, (T, T), minval=-br, maxval=br, dtype=jnp.float32)
    w_hh = jax.random.uniform(khh, (T, T), minval=-br, maxval=br, dtype=jnp.float32)
    b_ih = jax.random.uniform(kbi, (T,), minval=-br, maxval=br, dtype=jnp.float32)
    b_hh = jax.random.uniform(kbh, (T,), minval=-br, maxval=br, dtype=jnp.float32)

    out = recurrent_retention(x, wq, wk, wv, w_ih, w_hh, b_ih, b_hh, gamma)
    out = jax.block_until_ready(out)

    ref = _reference(x, wq, w_ih, w_hh, b_ih, b_hh, gamma)
    assert out.shape == (B, T, D)
    assert jnp.allclose(out, ref, atol=5e-2, rtol=5e-2), "kernel mismatch vs reference"

    print("KERNEL_OK")
</pallas_src>

<mosaic_0001>
module attributes {stable_mosaic.version = 11 : i64} {
  func.func @_recurrence_kernel(%arg0: i32, %arg1: memref<1x16xf32, #tpu.memory_space<vmem>>, %arg2: memref<16x16xf32, #tpu.memory_space<vmem>>, %arg3: memref<2x16xf32, #tpu.memory_space<vmem>>) attributes {dimension_semantics = [#tpu.dimension_semantics<arbitrary>], iteration_bounds = array<i64: 1>, scalar_prefetch = 0 : i64, scratch_operands = 0 : i64, tpu.core_type = #tpu.core_type<tc>, window_params = [{pipeline_mode = #tpu.pipeline_mode<synchronous>, transform_indices = @transform_0, window_bounds = array<i64: 1, 16>}, {pipeline_mode = #tpu.pipeline_mode<synchronous>, transform_indices = @transform_1, window_bounds = array<i64: 16, 16>}, {pipeline_mode = #tpu.pipeline_mode<synchronous>, transform_indices = @transform_2, window_bounds = array<i64: 2, 16>}]} {
    %c0 = arith.constant 0 : index
    %c0_0 = arith.constant 0 : index
    %0 = vector.load %arg1[%c0, %c0_0] : memref<1x16xf32, #tpu.memory_space<vmem>>, vector<1x16xf32>
    %c0_1 = arith.constant 0 : index
    %c0_2 = arith.constant 0 : index
    %1 = vector.load %arg2[%c0_1, %c0_2] : memref<16x16xf32, #tpu.memory_space<vmem>>, vector<16x16xf32>
    %cst = arith.constant 0.000000e+00 : f32
    %2 = vector.broadcast %cst : f32 to vector<1x16xf32>
    %c0_i32 = arith.constant 0 : i32
    %cst_3 = arith.constant dense<0.000000e+00> : vector<1x16xf32>
    %3 = tpu.matmul %2, %1, %cst_3 {dimension_numbers = #tpu.dot_dimension_numbers<[1], [0], [0], [1], [0, 0, 1, 1], [], []>} : vector<1x16xf32>, vector<16x16xf32>, vector<1x16xf32> -> vector<1x16xf32>
    %4 = arith.addf %0, %3 : vector<1x16xf32>
    %5 = math.tanh %4 : vector<1x16xf32>
    %6 = arith.index_cast %c0_i32 : i32 to index
    %c0_4 = arith.constant 0 : index
    %7 = vector.load %arg3[%6, %c0_4] : memref<2x16xf32, #tpu.memory_space<vmem>>, vector<1x16xf32>
    tpu.vector_store %arg3[%6, %c0_4], %5 {strides = array<i32>} : memref<2x16xf32, #tpu.memory_space<vmem>>, vector<1x16xf32>,
    %c1_i32 = arith.constant 1 : i32
    %cst_5 = arith.constant dense<0.000000e+00> : vector<1x16xf32>
    %8 = tpu.matmul %5, %1, %cst_5 {dimension_numbers = #tpu.dot_dimension_numbers<[1], [0], [0], [1], [0, 0, 1, 1], [], []>} : vector<1x16xf32>, vector<16x16xf32>, vector<1x16xf32> -> vector<1x16xf32>
    %9 = arith.addf %0, %8 : vector<1x16xf32>
    %10 = math.tanh %9 : vector<1x16xf32>
    %11 = arith.index_cast %c1_i32 : i32 to index
    %c0_6 = arith.constant 0 : index
    %12 = vector.load %arg3[%11, %c0_6] : memref<2x16xf32, #tpu.memory_space<vmem>>, vector<1x16xf32>
    tpu.vector_store %arg3[%11, %c0_6], %10 {strides = array<i32>} : memref<2x16xf32, #tpu.memory_space<vmem>>, vector<1x16xf32>,
    %c2_i32 = arith.constant 2 : i32
    return
  }
  func.func @transform_0(%arg0: i32) -> (i32, i32) {
    %c0_i32 = arith.constant 0 : i32
    %c0_i32_0 = arith.constant 0 : i32
    %c0_i32_1 = arith.constant 0 : i32
    return %c0_i32, %c0_i32_0 : i32, i32
  }
  func.func @transform_1(%arg0: i32) -> (i32, i32) {
    %c0_i32 = arith.constant 0 : i32
    %c0_i32_0 = arith.constant 0 : i32
    %c0_i32_1 = arith.constant 0 : i32
    return %c0_i32, %c0_i32_0 : i32, i32
  }
  func.func @transform_2(%arg0: i32) -> (i32, i32) {
    %c0_i32 = arith.constant 0 : i32
    %c0_i32_0 = arith.constant 0 : i32
    %c0_i32_1 = arith.constant 0 : i32
    return %c0_i32, %c0_i32_0 : i32, i32
  }
}

</mosaic_0001>

<bundles_post_ra>
// kernel: tpu_custom_call.1
= control target key start
LH: loop header
LB: loop body
LE: loop exit
PB: predicated region body
PF: predicated region fallthrough
CT: control target
= control target key end

     0   :  { %7 = vsyncpa [#allocation3], 0  ;;  %s340_s0 = inlined_call_operand.hbm [shape: f32[1,16], index: 0, kind: input, shape index: {}]   ;;  %s341_s1 = inlined_call_operand.hbm [shape: f32[16,16], index: 1, kind: input, shape index: {}]   ;;  %s342_s2 = inlined_call_operand.hbm [shape: f32[2,16], index: 2, kind: output, shape index: {}]  }
   0x1   :  { %8 = vsyncpa [#allocation6], 0 }
   0x2   :  { %9 = vsyncpa [#allocation4], 0  ;;  %s309_s9 = smov [#allocation2]   ;;  %s310_s11 = smov [#allocation5]  }
   0x3   :  { %s16_s10 = sshll.u32 %s309_s9, 4  ;;  %s25_s12 = sshll.u32 %s310_s11, 4  ;;  %s17_s10 = int_to_ptr.vmem [resolvable:$true] %s16_s10  ;;  %s26_s12 = int_to_ptr.vmem [resolvable:$true] %s25_s12 }
   0x4   :  { %s251_s13 = scalar_lea.vmem %s17_s10, 16  ;;  %s255_s14 = scalar_lea.vmem %s17_s10, 32 }
   0x5   :  { %p252_p0 = scmp.ne.s32.totalorder %s17_s10, %s251_s13  ;;  %p256_p1 = scmp.lt.s32.totalorder %s17_s10, %s17_s10 }
   0x6   :  { %p257_p2 = scmp.lt.s32.totalorder %s255_s14, %s251_s13 }
   0x8   :  { %p258_p3 = por %p257_p2, %p256_p1 }
   0xa   :  { %p259_p4 = pnand %p258_p3, %p252_p0 }
   0xc   :  { %262 = shalt.err (!%p259_p4)
}
   0xd   :  { %19 = dma.hbm_to_vmem [thread:$0]  %s340_s0, 16, %s17_s10, [#allocation3]  }
   0xe   :  { %s271_s17 = scalar_lea.vmem %s26_s12, 256  ;;  %p276_p6 = scmp.lt.s32.totalorder %s26_s12, %s26_s12 }
   0xf   :  { %p272_p5 = scmp.ne.s32.totalorder %s26_s12, %s271_s17  ;;  %p277_p7 = scmp.lt.s32.totalorder %s271_s17, %s271_s17 }
  0x11   :  { %p278_p8 = por %p277_p7, %p276_p6 }
  0x13   :  { %p279_p9 = pnand %p278_p8, %p272_p5 }
  0x15   :  { %282 = shalt.err (!%p279_p9)
}
  0x16   :  { %s311_s18 = smov 128   ;;  %s312_s19 = smov 8  }
  0x17   :  { %31 = dma.hbm_to_vmem [thread:$0]  %s341_s1, 256, %s26_s12, [#allocation6], %s311_s18, %s311_s18, %s312_s19  }
  0x18   :  { %303 = dma.done.wait [#allocation3], 16  }
  0x19   :  { %304 = vsyncadd [#allocation3], 4294967280 }
  0x1a   :  { %305 = dma.done.wait [#allocation6], 256  }
  0x1b   :  { %306 = vsyncadd [#allocation6], 4294967040  ;;  %v313_v0 = vmov 0.0   ;;  %vm314_vm0 = vmmov 0   ;;  %v40_v1 = vld [vmem:[#allocation5 + $0x8] sm:$0xff]  ;;  %v39_v2 = vld [vmem:[#allocation5] sm:$0xff] }
  0x1c   :  { %218 = vmatprep.subr.mxu0 %v313_v0  ;;  %222 = vmatprep.mubr.msk.f32.mxu0 %vm314_vm0, %v313_v0  ;;  %v38_v3 = vld [vmem:[#allocation2] sm:$0x1]  ;;  %vm41_vm1 = vcmask 130048   ;;  %vm117_vm2 = vcmask 122880   ;;  %s315_s0 = smov [#allocation7]  }
  0x1d   :  { %225 = vmatprep.subr.mxu1 %v313_v0  ;;  %229 = vmatprep.mubr.msk.f32.mxu1 %vm314_vm0, %v313_v0  ;;  %s201_s1 = sshll.u32 %s315_s0, 4  ;;  %s202_s1 = int_to_ptr.vmem [resolvable:$true] %s201_s1 }
  0x1e   :  { %219 = vmatpush3.msra.mxu0 %v40_v1  ;;  %226 = vmatpush3.msra.mxu1 %v40_v1  ;;  %s283_s22 = scalar_lea.vmem %s202_s1, 32  ;;  %p288_p11 = scmp.lt.s32.totalorder %s202_s1, %s202_s1 }
  0x1f   :  { %220 = vmatprep.subr.mxu0 %v313_v0  ;;  %227 = vmatprep.subr.mxu1 %v313_v0  ;;  %p284_p10 = scmp.ne.s32.totalorder %s202_s1, %s283_s22  ;;  %p289_p12 = scmp.lt.s32.totalorder %s283_s22, %s283_s22 }
  0x20   :  { %221 = vmatpush3.msra.mxu0 %v39_v2  ;;  %228 = vmatpush3.msra.mxu1 %v39_v2 }
  0x21   :  { %223 = vmatmul.mubr.f32.vlgmr.msra.gmra.mxu0 %v313_v0  ;;  %p290_p13 = por %p289_p12, %p288_p11 }
  0x23   :  { %p291_p0 = pnand %p290_p13, %p284_p10 }
  0xe1   :  { %v111_v4 = vpop.f32.mrf.mxu0 }
  0xe2   :  { %v115_v5 = vadd.f32 %v111_v4, %v38_v3 }
  0xe3   :  { %v224_v6 = vpop.f32.mrf.mxu0 }
  0xe4   :  { %239 = vtanh.f32 %v115_v5 }
  0xf1   :  { %v240_v7 = vpop.eup %239 }
  0xf2   :  { %230 = vmatmul.mubr.msk.f32.vlgmr.msra.gmra.mxu1 %vm41_vm1, %v240_v7  ;;  %118 = vst.msk [vmem:[#allocation7] sm:$0x1] %vm117_vm2, %v240_v7 }
 0x1b2   :  { %v188_v8 = vpop.f32.mrf.mxu1 }
 0x1b3   :  { %v192_v9 = vadd.f32 %v188_v8, %v38_v3 }
 0x1b4   :  { %v231_v10 = vpop.f32.mrf.mxu1 }
 0x1b5   :  { %241 = vtanh.f32 %v192_v9 }
 0x1c2   :  { %v242_v11 = vpop.eup %241 }
 0x1c3   :  { %194 = vst.msk [vmem:[#allocation7 + $0x1] sm:$0x1] %vm117_vm2, %v242_v11 }
 0x1c4   :  { %294 = shalt.err (!%p291_p0)
}
 0x1c5   :  { %204 = dma.vmem_to_hbm [thread:$0]  %s202_s1, 32, %s342_s2, [#allocation4]  }
 0x1c6   :  { %307 = dma.done.wait [#allocation4], 32  }
 0x1c7   :  { %308 = vsyncadd [#allocation4], 4294967264 }
 0x1c8   :  { %208 = vsyncpa [#allocation3], 1 }
 0x1c9   :  { %209 = vsyncpa [#allocation6], 1 }
 0x1ca   :  { %210 = vsyncpa [#allocation4], 1 }

</bundles_post_ra>
